<compile_context>
chip_gen: v6e
topology: v6e:2x2x1
jax: 0.10.0
libtpu: 0.0.40
codegen_flags: <defaults>
</compile_context>

<pallas_src>
import functools

import jax
import jax.numpy as jnp
from jax.experimental import pallas as pl
from jax.experimental.pallas import tpu as pltpu


# ----------------------------- hw / tiling helpers -----------------------------

@functools.lru_cache(maxsize=1)
def _hw_params():
    """Returns (target_block_bytes_f32_equiv, vmem_limit_cap_bytes) per TPU gen."""
    vmem_cap = None
    try:
        vmem_cap = int(pltpu.get_tpu_info().vmem_capacity_bytes)
    except Exception:
        vmem_cap = None
    if vmem_cap is not None and vmem_cap <= (64 << 20):
        # v7x-class: 64 MiB VMEM/TC, ~3.2 TB/s -> bigger blocks, tighter clamp.
        return 6 << 20, 48 << 20
    if vmem_cap is None:
        # Unknown hardware: be conservative on both.
        return 4 << 20, 48 << 20
    # v5e / v6e: 128 MiB VMEM, 0.8-1.4 TB/s -> 4 MiB blocks already >=85% roofline.
    return 4 << 20, 56 << 20


def _vmem_limit_bytes(tile_elems, in_itemsize, out_itemsize, cap):
    """Scoped-VMEM request: double-buffered in/out blocks + ~3 f32 temps + headroom."""
    need = tile_elems * (2 * in_itemsize + 2 * out_itemsize + 3 * 4) + (6 << 20)
    return int(min(max(need, 32 << 20), cap))


def _pick_tm(m_rows, row_width, itemsize, target_bytes):
    """Row tile for a (rows, width) slab.

    Sized from the f32 working set, rounded to the packed sublane multiple,
    capped so the grid keeps >=4 steps (>=2 for medium sizes) for pipelining and
    v7x dual-TensorCore sharding.
    """
    sub = 32 // itemsize                                   # 8 (f32) / 16 (bf16) / 32 (i8)
    target_elems = max(target_bytes // 4, row_width * sub)  # f32-equivalent budget
    tm = max(sub, (target_elems // max(row_width, 1)) // sub * sub)
    if m_rows >= 8 * sub:
        tm = min(tm, max(sub, (m_rows // 4) // sub * sub))   # keep >= 4 grid steps
    elif m_rows > 2 * sub:
        half = -(-m_rows // 2)
        tm = min(tm, max(sub, -(-half // sub) * sub))        # keep >= 2 grid steps
    return min(tm, m_rows)


def _pick_fold(m_rows, c, max_width=512):
    """Smallest g with (g*c) % 128 == 0 and m_rows % g == 0, g*c <= max_width."""
    if c % 128 == 0:
        return 1
    g = 2
    while g * c <= max_width:
        if (g * c) % 128 == 0 and m_rows % g == 0:
            return g
        g += 1
    return 1


# ------------------------------- kernels ----------------------------------

def _ln_rows_kernel(x_ref, w_ref, b_ref, o_ref, *, eps):
    """LayerNorm over the last axis of a (tm, C) tile. w/b: (1, C)."""
    x = x_ref[...].astype(jnp.float32)
    mean = jnp.mean(x, axis=-1, keepdims=True)
    xc = x - mean
    var = jnp.mean(xc * xc, axis=-1, keepdims=True)
    inv = jax.lax.rsqrt(var + eps)
    w = w_ref[...].astype(jnp.float32)
    b = b_ref[...].astype(jnp.float32)
    o_ref[...] = (xc * (inv * w) + b).astype(o_ref.dtype)


def _ln_folded_kernel(x_ref, w_ref, b_ref, o_ref, *, eps, c, g):
    """Lane-dense LayerNorm: g logical rows of width c folded into one (g*c)-lane row.

    Per-segment sums / broadcasts via tiny segment matrices S (g*c, g) and
    St (g, g*c) on the MXU (built in-kernel from iota), so loads/stores stay
    full-lane-width and the reduction does not land on the VPU/XLU.
    """
    cw = g * c
    x = x_ref[...].astype(jnp.float32)                 # (tm, g*c)

    row = jax.lax.broadcasted_iota(jnp.int32, (cw, g), 0)
    col = jax.lax.broadcasted_iota(jnp.int32, (cw, g), 1)
    S = (row // c == col).astype(jnp.float32)          # (g*c, g)
    rowt = jax.lax.broadcasted_iota(jnp.int32, (g, cw), 0)
    colt = jax.lax.broadcasted_iota(jnp.int32, (g, cw), 1)
    St = (colt // c == rowt).astype(jnp.float32)       # (g, g*c)

    inv_c = 1.0 / float(c)
    mean = jnp.dot(x, S, preferred_element_type=jnp.float32) * inv_c       # (tm, g)
    mean_b = jnp.dot(mean, St, preferred_element_type=jnp.float32)         # (tm, g*c)
    xc = x - mean_b
    var = jnp.dot(xc * xc, S, preferred_element_type=jnp.float32) * inv_c  # (tm, g)
    inv = jax.lax.rsqrt(var + eps)
    inv_b = jnp.dot(inv, St, preferred_element_type=jnp.float32)           # (tm, g*c)

    w = w_ref[...].astype(jnp.float32)                 # (1, g*c)
    b = b_ref[...].astype(jnp.float32)
    o_ref[...] = (xc * (inv_b * w) + b).astype(o_ref.dtype)


def _ln_cf_kernel(x_ref, w_ref, b_ref, o_ref, *, eps):
    """channels_first LayerNorm on a (tn, C, tl) tile; reduction over C. w/b: (1, C, 1)."""
    x = x_ref[...].astype(jnp.float32)             # (tn, C, tl)
    mean = jnp.mean(x, axis=1, keepdims=True)      # (tn, 1, tl)
    xc = x - mean
    var = jnp.mean(xc * xc, axis=1, keepdims=True)
    inv = jax.lax.rsqrt(var + eps)
    w = w_ref[...].astype(jnp.float32)             # (1, C, 1)
    b = b_ref[...].astype(jnp.float32)
    o_ref[...] = (xc * inv * w + b).astype(o_ref.dtype)


# ------------------------------- wrappers ----------------------------------

def _layernorm_rows(x2d, weight, bias, eps):
    """x2d: (M, C) -> LayerNorm over last axis with per-channel affine."""
    M, C = x2d.shape
    in_item = jnp.dtype(x2d.dtype).itemsize
    target_bytes, vmem_cap = _hw_params()

    g = _pick_fold(M, C)
    if g > 1:
        xk = x2d.reshape(M // g, g * C)            # free reshape of contiguous data
        w = jnp.tile(weight, g).reshape(1, g * C)
        b = jnp.tile(bias, g).reshape(1, g * C)
        kernel = functools.partial(_ln_folded_kernel, eps=eps, c=C, g=g)
    else:
        xk = x2d
        w = weight.reshape(1, C)
        b = bias.reshape(1, C)
        kernel = functools.partial(_ln_rows_kernel, eps=eps)

    Mr, CW = xk.shape
    tm = _pick_tm(Mr, CW, in_item, target_bytes)
    grid = (pl.cdiv(Mr, tm),)
    tile_elems = tm * CW

    out = pl.pallas_call(
        kernel,
        out_shape=jax.ShapeDtypeStruct((Mr, CW), xk.dtype),
        grid_spec=pltpu.PrefetchScalarGridSpec(
            num_scalar_prefetch=0,
            grid=grid,
            in_specs=[
                pl.BlockSpec((tm, CW), lambda i: (i, 0)),
                pl.BlockSpec((1, CW), lambda i: (0, 0)),
                pl.BlockSpec((1, CW), lambda i: (0, 0)),
            ],
            out_specs=pl.BlockSpec((tm, CW), lambda i: (i, 0)),
        ),
        compiler_params=pltpu.CompilerParams(
            dimension_semantics=("parallel",),
            vmem_limit_bytes=_vmem_limit_bytes(tile_elems, in_item, in_item, vmem_cap),
        ),
    )(xk, w, b)

    if g > 1:
        return out.reshape(M, C)
    return out


def _layernorm_channels_first(x, weight, bias, eps):
    """x: (N, C, H, W), normalize over C. Transpose-free: free reshape to (N, C, H*W)."""
    N, C, H, W = x.shape
    L = H * W
    x3 = x.reshape(N, C, L)
    in_item = jnp.dtype(x3.dtype).itemsize
    target_bytes, vmem_cap = _hw_params()
    target_elems = max(target_bytes // 4, C * 128)

    # Spatial tile: multiple of 128 lanes, sized from the f32-equivalent budget.
    tl = max(128, (target_elems // max(C, 1)) // 128 * 128)

    if tl >= L:
        # Whole spatial extent fits in one block: tile over batch instead so
        # small-spatial stages (e.g. 768 x 7 x 7) amortize per-step overhead.
        tl = L
        per_img = C * L
        tn = max(1, target_elems // max(per_img, 1))
        if N >= 8:
            tn = min(tn, max(1, N // 4))        # keep >= 4 grid steps
        elif N >= 2:
            tn = min(tn, -(-N // 2))            # keep >= 2 grid steps (v7x: 2 TCs)
        tn = min(tn, N)
        grid = (pl.cdiv(N, tn),)
        imap = lambda n: (n, 0, 0)
    else:
        tn = 1
        gl = pl.cdiv(L, tl)
        # Larger-extent parallel axis first (megacore sharding on v7x).
        if gl >= N:
            grid = (gl, N)
            imap = lambda s, n: (n, 0, s)
        else:
            grid = (N, gl)
            imap = lambda n, s: (n, 0, s)

    tile_elems = tn * C * tl
    w3 = weight.reshape(1, C, 1)
    b3 = bias.reshape(1, C, 1)

    out = pl.pallas_call(
        functools.partial(_ln_cf_kernel, eps=eps),
        out_shape=jax.ShapeDtypeStruct((N, C, L), x3.dtype),
        grid_spec=pltpu.PrefetchScalarGridSpec(
            num_scalar_prefetch=0,
            grid=grid,
            in_specs=[
                pl.BlockSpec((tn, C, tl), imap),
                pl.BlockSpec((1, C, 1), lambda *idx: (0, 0, 0)),
                pl.BlockSpec((1, C, 1), lambda *idx: (0, 0, 0)),
            ],
            out_specs=pl.BlockSpec((tn, C, tl), imap),
        ),
        compiler_params=pltpu.CompilerParams(
            dimension_semantics=("parallel",) * len(grid),
            vmem_limit_bytes=_vmem_limit_bytes(tile_elems, in_item, in_item, vmem_cap),
        ),
    )(x3, w3, b3)
    return out.reshape(N, C, H, W)


def layer_norm(x, weight, bias, eps=1e-6, data_format="channels_last"):
    if data_format not in ("channels_last", "channels_first"):
        raise NotImplementedError
    if data_format == "channels_last":
        C = x.shape[-1]
        lead = x.shape[:-1]
        y = _layernorm_rows(x.reshape(-1, C), weight, bias, eps)
        return y.reshape(*lead, C)
    return _layernorm_channels_first(x, weight, bias, eps)


# ------------------------------- reference ---------------------------------

def _ref_layer_norm(x, weight, bias, eps, data_format):
    x32 = x.astype(jnp.float32)
    if data_format == "channels_last":
        axis = -1
        w, b = weight, bias
    else:
        axis = 1
        w, b = weight[:, None, None], bias[:, None, None]
    u = jnp.mean(x32, axis=axis, keepdims=True)
    s = jnp.mean((x32 - u) ** 2, axis=axis, keepdims=True)
    y = (x32 - u) / jnp.sqrt(s + eps)
    y = y * w + b if data_format == "channels_last" else w * y + b
    return y.astype(x.dtype)


if __name__ == "__main__":
    key = jax.random.PRNGKey(0)
    k1, k2, k3, k4, k5 = jax.random.split(key, 5)
    eps = 1e-6

    def check(y, ref, tol):
        assert y.shape == ref.shape
        err = jnp.max(jnp.abs(y.astype(jnp.float32) - ref.astype(jnp.float32)))
        assert float(err) < tol, float(err)

    # --- channels_first, C = 32 (PyTorch conv NCHW), batch-tiled CF path ---
    C = 32
    w32 = jnp.ones((C,), jnp.float32) + 0.01 * jnp.arange(C, dtype=jnp.float32)
    b32 = jnp.zeros((C,), jnp.float32) + 0.001 * jnp.arange(C, dtype=jnp.float32)
    x_cf = jax.random.normal(k1, (2, C, 16, 16), jnp.float32)
    y_cf = jax.block_until_ready(layer_norm(x_cf, w32, b32, eps, "channels_first"))
    check(y_cf, _ref_layer_norm(x_cf, w32, b32, eps, "channels_first"), 1e-3)

    # --- channels_last, C = 32 (fold g=4 -> 128 lanes) ---
    x_cl = jax.random.normal(k2, (2, 16, 16, C), jnp.float32)
    y_cl = jax.block_until_ready(layer_norm(x_cl, w32, b32, eps, "channels_last"))
    check(y_cl, _ref_layer_norm(x_cl, w32, b32, eps, "channels_last"), 1e-3)

    # --- channels_last, C = 48, ragged rows (105), no fold possible (105 % 8 != 0) ---
    C2 = 48
    w48 = jnp.ones((C2,), jnp.float32) + 0.01 * jnp.arange(C2, dtype=jnp.float32)
    b48 = jnp.zeros((C2,), jnp.float32) + 0.001 * jnp.arange(C2, dtype=jnp.float32)
    x_rg = jax.random.normal(k3, (3, 5, 7, C2), jnp.float32)
    y_rg = jax.block_until_ready(layer_norm(x_rg, w48, b48, eps, "channels_last"))
    check(y_rg, _ref_layer_norm(x_rg, w48, b48, eps, "channels_last"), 1e-3)

    # --- channels_last, ConvNeXt width C = 96 (fold g=4 -> 384 lanes), f32 and bf16 ---
    C3 = 96
    w96 = jnp.ones((C3,), jnp.float32) + 0.01 * jnp.arange(C3, dtype=jnp.float32)
    b96 = jnp.zeros((C3,), jnp.float32) + 0.001 * jnp.arange(C3, dtype=jnp.float32)
    x96 = jax.random.normal(k4, (2, 8, 8, C3), jnp.float32)
    y96 = jax.block_until_ready(layer_norm(x96, w96, b96, eps, "channels_last"))
    check(y96, _ref_layer_norm(x96, w96, b96, eps, "channels_last"), 1e-3)

    x96b = x96.astype(jnp.bfloat16)
    y96b = jax.block_until_ready(layer_norm(x96b, w96, b96, eps, "channels_last"))
    check(y96b, _ref_layer_norm(x96b, w96, b96, eps, "channels_last"), 1e-1)

    # --- channels_first, small spatial extent (batch-tiled block, tn > 1) ---
    C4 = 64
    w64 = jnp.ones((C4,), jnp.float32) + 0.01 * jnp.arange(C4, dtype=jnp.float32)
    b64 = jnp.zeros((C4,), jnp.float32) + 0.001 * jnp.arange(C4, dtype=jnp.float32)
    x_sm = jax.random.normal(k5, (4, C4, 4, 4), jnp.float32)
    y_sm = jax.block_until_ready(layer_norm(x_sm, w64, b64, eps, "channels_first"))
    check(y_sm, _ref_layer_norm(x_sm, w64, b64, eps, "channels_first"), 1e-3)

    print("KERNEL_OK")
</pallas_src>

<mosaic_0001>
module attributes {stable_mosaic.version = 11 : i64} {
  func.func @_ln_cf_kernel(%arg0: i32, %arg1: memref<1x32x256xf32, #tpu.memory_space<vmem>>, %arg2: memref<1x32x1xf32, #tpu.memory_space<vmem>>, %arg3: memref<1x32x1xf32, #tpu.memory_space<vmem>>, %arg4: memref<1x32x256xf32, #tpu.memory_space<vmem>>) attributes {dimension_semantics = [#tpu.dimension_semantics<parallel>], iteration_bounds = array<i64: 2>, scalar_prefetch = 0 : i64, scratch_operands = 0 : i64, tpu.core_type = #tpu.core_type<tc>, window_params = [{transform_indices = @transform_0, window_bounds = array<i64: 1, 32, 256>}, {pipeline_mode = #tpu.pipeline_mode<synchronous>, transform_indices = @transform_1, window_bounds = array<i64: 1, 32, 1>}, {pipeline_mode = #tpu.pipeline_mode<synchronous>, transform_indices = @transform_2, window_bounds = array<i64: 1, 32, 1>}, {transform_indices = @transform_3, window_bounds = array<i64: 1, 32, 256>}]} {
    %c0 = arith.constant 0 : index
    %c0_0 = arith.constant 0 : index
    %c0_1 = arith.constant 0 : index
    %0 = vector.load %arg1[%c0, %c0_0, %c0_1] : memref<1x32x256xf32, #tpu.memory_space<vmem>>, vector<1x32x256xf32>
    %cst = arith.constant dense<0.000000e+00> : vector<1x256xf32>
    %1 = vector.multi_reduction <add>, %0, %cst [1] : vector<1x32x256xf32> to vector<1x256xf32>
    %2 = vector.shape_cast %1 : vector<1x256xf32> to vector<1x1x256xf32>
    %cst_2 = arith.constant 3.200000e+01 : f32
    %3 = vector.broadcast %cst_2 : f32 to vector<1x1x256xf32>
    %4 = arith.divf %2, %3 : vector<1x1x256xf32>
    %5 = vector.broadcast %4 : vector<1x1x256xf32> to vector<1x32x256xf32>
    %6 = arith.subf %0, %5 : vector<1x32x256xf32>
    %7 = arith.mulf %6, %6 : vector<1x32x256xf32>
    %cst_3 = arith.constant dense<0.000000e+00> : vector<1x256xf32>
    %8 = vector.multi_reduction <add>, %7, %cst_3 [1] : vector<1x32x256xf32> to vector<1x256xf32>
    %9 = vector.shape_cast %8 : vector<1x256xf32> to vector<1x1x256xf32>
    %cst_4 = arith.constant 3.200000e+01 : f32
    %10 = vector.broadcast %cst_4 : f32 to vector<1x1x256xf32>
    %11 = arith.divf %9, %10 : vector<1x1x256xf32>
    %cst_5 = arith.constant 9.99999997E-7 : f32
    %12 = vector.broadcast %cst_5 : f32 to vector<1x1x256xf32>
    %13 = arith.addf %11, %12 : vector<1x1x256xf32>
    %14 = math.rsqrt %13 : vector<1x1x256xf32>
    %c0_6 = arith.constant 0 : index
    %c0_7 = arith.constant 0 : index
    %c0_8 = arith.constant 0 : index
    %15 = vector.load %arg2[%c0_6, %c0_7, %c0_8] : memref<1x32x1xf32, #tpu.memory_space<vmem>>, vector<1x32x1xf32>
    %c0_9 = arith.constant 0 : index
    %c0_10 = arith.constant 0 : index
    %c0_11 = arith.constant 0 : index
    %16 = vector.load %arg3[%c0_9, %c0_10, %c0_11] : memref<1x32x1xf32, #tpu.memory_space<vmem>>, vector<1x32x1xf32>
    %17 = vector.broadcast %14 : vector<1x1x256xf32> to vector<1x32x256xf32>
    %18 = arith.mulf %6, %17 : vector<1x32x256xf32>
    %19 = vector.broadcast %15 : vector<1x32x1xf32> to vector<1x32x256xf32>
    %20 = arith.mulf %18, %19 : vector<1x32x256xf32>
    %21 = vector.broadcast %16 : vector<1x32x1xf32> to vector<1x32x256xf32>
    %22 = arith.addf %20, %21 : vector<1x32x256xf32>
    %c0_12 = arith.constant 0 : index
    %c0_13 = arith.constant 0 : index
    %c0_14 = arith.constant 0 : index
    %23 = vector.load %arg4[%c0_12, %c0_13, %c0_14] : memref<1x32x256xf32, #tpu.memory_space<vmem>>, vector<1x32x256xf32>
    tpu.vector_store %arg4[%c0_12, %c0_13, %c0_14], %22 {strides = array<i32>} : memref<1x32x256xf32, #tpu.memory_space<vmem>>, vector<1x32x256xf32>,
    return
  }
  func.func @transform_0(%arg0: i32) -> (i32, i32, i32) {
    %c0_i32 = arith.constant 0 : i32
    %c0_i32_0 = arith.constant 0 : i32
    %c0_i32_1 = arith.constant 0 : i32
    return %arg0, %c0_i32, %c0_i32_0 : i32, i32, i32
  }
  func.func @transform_1(%arg0: i32) -> (i32, i32, i32) {
    %c0_i32 = arith.constant 0 : i32
    %c0_i32_0 = arith.constant 0 : i32
    %c0_i32_1 = arith.constant 0 : i32
    %c0_i32_2 = arith.constant 0 : i32
    return %c0_i32, %c0_i32_0, %c0_i32_1 : i32, i32, i32
  }
  func.func @transform_2(%arg0: i32) -> (i32, i32, i32) {
    %c0_i32 = arith.constant 0 : i32
    %c0_i32_0 = arith.constant 0 : i32
    %c0_i32_1 = arith.constant 0 : i32
    %c0_i32_2 = arith.constant 0 : i32
    return %c0_i32, %c0_i32_0, %c0_i32_1 : i32, i32, i32
  }
  func.func @transform_3(%arg0: i32) -> (i32, i32, i32) {
    %c0_i32 = arith.constant 0 : i32
    %c0_i32_0 = arith.constant 0 : i32
    %c0_i32_1 = arith.constant 0 : i32
    return %arg0, %c0_i32, %c0_i32_0 : i32, i32, i32
  }
}

</mosaic_0001>

<bundles_post_ra>
// kernel: tpu_custom_call.1
= control target key start
LH: loop header
LB: loop body
LE: loop exit
PB: predicated region body
PF: predicated region fallthrough
CT: control target
= control target key end

     0   :  { %8 = vsyncpa [#allocation3], 0  ;;  %s811_s0 = inlined_call_operand.hbm [shape: f32[2,32,256], index: 0, kind: input, shape index: {}]   ;;  %s812_s1 = inlined_call_operand.vmem [shape: f32[1,32,1], index: 1, kind: input, shape index: {}]   ;;  %s813_s2 = inlined_call_operand.vmem [shape: f32[1,32,1], index: 2, kind: input, shape index: {}]   ;;  %s814_s3 = inlined_call_operand.hbm [shape: f32[2,32,256], index: 3, kind: output, shape index: {}]  }
   0x1   :  { %10 = vsyncpa [#allocation3 + $0x1], 0 }
   0x2   :  { %11 = vsyncpa [#allocation4], 0 }
   0x3   :  { %13 = vsyncpa [#allocation4 + $0x1], 0  ;;  %s619_s12 = smov 0   ;;  %s621_s13 = smov 0  }
   0x4   :  { %s623_s14 = smov 0   ;;  %s625_s15 = smov 0  }
   0x5 LB: > { %s640_s16 = sadd.s32 4294967295, %s590_s15   ;;  %s425_s17 = sadd.s32 4294967294, %s590_s15   ;;  %s590_s15 = sphi %s625_s15, %s829_s15   ;;  %s586_s14 = sphi %s623_s14, %s828_s14   ;;  %s582_s13 = sphi %s621_s13, %s827_s13   ;;  %s578_s12 = sphi %s619_s12, %s826_s12  }
   0x6   : > { %s644_s18 = sadd.s32 1, %s590_s15   ;;  %s26_s19 = sadd.s32 1, %s586_s14 }
   0x7   : > { %s23_s20 = ssub.s32 %s590_s15, %s644_s18  ;;  %p33_p0 = scmp.ne.s32.totalorder %s586_s14, %s582_s13 }
   0x8   : > { %p24_p1 = scmp.eq.s32.totalorder %s23_s20, 0  ;;  %p34_p2 = scmp.eq.s32.totalorder %s590_s15, 0 }
   0x9   : > { %p39_p3 = scmp.ne.s32.totalorder %s582_s13, %s578_s12  ;;  %p40_p4 = scmp.eq.s32.totalorder %s640_s16, 0 }
   0xa   : > { %s656_s21 = scalar_select %p24_p1, %s586_s14, %s26_s19  }
   0xb   : > { %p658_p5 = por %p34_p2, %p33_p0  ;;  %p662_p6 = por %p40_p4, %p39_p3 }
   0xc   : > { %p105_p7 = scmp.eq.s32.totalorder %s640_s16, 1  ;;  %p111_p8 = scmp.eq.s32.totalorder %s425_s17, 1 }
   0xd   : > { %s818_s23 = scalar_select %p662_p6, 1, 0 }
   0xe   : > { %p453_p10 = scmp.lt.s32.totalorder %s590_s15, 2  ;;  %p669_p11 = por %p105_p7, %p33_p0 }
   0xf   : > { %p673_p12 = por %p111_p8, %p39_p3  ;;  %s137_s26 = sand.u32 1, %s586_s14  }
  0x10   : > { %s819_s24 = scalar_select %p669_p11, 1, 0 }
  0x11   : > { %s820_s25 = scalar_select %p673_p12, 1, 0 }
  0x12   : > { %s439_s27 = sshll.u32 %s590_s15, 10  ;;  %s428_s28 = sshll.u32 %s137_s26, 6 }
  0x13   : > { %s682_s4 = scalar_lea.hbm %s811_s0, %s439_s27  ;;  %s141_s5 = scalar_lea.vmem [#allocation2], %s428_s28 }
  0x14   : > { %s148_s6 = sshll.u32 %s141_s5, 4  ;;  %p686_p13 = pnand %p453_p10, %p658_p5  ;;  %s690_s6 = int_to_ptr.vmem [resolvable:$true] %s148_s6 }
  0x15   : > { %s692_s8 = scalar_lea.sflag [#allocation3], %s137_s26  ;;  %s498_s9 = scalar_lea.hbm %s682_s4, 1024 }
  0x16   : > { %p499_p0 = scmp.ne.s32.totalorder %s682_s4, %s498_s9  ;;  %p500_p1 = pneg %p686_p13 }
  0x17   : > { %s503_s17 = scalar_lea.hbm %s811_s0, 2048  ;;  %p504_p4 = scmp.lt.s32.totalorder %s682_s4, %s811_s0 }
  0x18   : > { %p501_p2 = pnand %p500_p1, %p499_p0  ;;  %p505_p5 = scmp.lt.s32.totalorder %s503_s17, %s498_s9 }
  0x1a   : > { %p502_p3 = pneg %p501_p2  ;;  %p506_p7 = por %p505_p5, %p504_p4 }
  0x1c   : > { %p507_p8 = pnand %p506_p7, %p502_p3 }
  0x1e   : > { %510 = shalt.err (!%p507_p8)
}
  0x1f   : > { %s511_s22 = scalar_lea.vmem %s690_s6, 1024  ;;  %s592_s26 = smov [#allocation2]  }
  0x20   : > { %p512_p10 = scmp.ne.s32.totalorder %s690_s6, %s511_s22  ;;  %s516_s27 = sshll.u32 %s592_s26, 4  ;;  %s517_s27 = int_to_ptr.vmem [resolvable:$false] %s516_s27 }
  0x21   : > { %s518_s28 = scalar_lea.vmem %s517_s27, 2048  ;;  %p519_p2 = scmp.lt.s32.totalorder %s690_s6, %s517_s27 }
  0x22   : > { %p514_p9 = pnand %p512_p10, %p500_p1  ;;  %p520_p12 = scmp.lt.s32.totalorder %s518_s28, %s511_s22 }
  0x24   : > { %p515_p0 = pneg %p514_p9  ;;  %p521_p11 = por %p520_p12, %p519_p2 }
  0x26   : > { %p522_p6 = pnand %p521_p11, %p515_p0 }
  0x28   : > { %525 = shalt.err (!%p522_p6)
}
  0x29   : > { %s593_s29 = smov 256   ;;  %s594_s30 = smov 16  }
  0x2a   : > { %448 = dma.hbm_to_vmem [thread:$0]  (!%p686_p13), %s682_s4, 1024, %s690_s6, %s692_s8, %s593_s29, %s593_s29, %s594_s30  }
  0x2b   : > { %p431_p9 = scmp.ge.s32.totalorder %s590_s15, 1  ;;  %p156_p1 = scmp.lt.s32.totalorder %s590_s15, 3 }
  0x2d   : > { %p157_p3 = pnand %p431_p9, %p156_p1 }
  0x2e   : > { %s716_s5 = sand.u32 (!%p157_p3), 1, %s582_s13   ;;  %p822_p6 = scmp.ne.s32.totalorder (!%p157_p3), %s818_s23, 0 }
  0x2f   : > { %160 = sbr.rel (%p157_p3) target bundleno = 208 (0xd0), region = 32  ;;  %s432_s9 = sshll.u32 (!%p157_p3), %s716_s5, 6 }
  0x30   : > { %s163_s10 = scalar_lea.sflag (!%p157_p3), [#allocation3], %s716_s5  ;;  %s722_s11 = scalar_lea.vmem (!%p157_p3), [#allocation2], %s432_s9 }
  0x34   : > { %569 = dma.done.wait (%p822_p6), %s163_s10, 1024  }
  0x35   : > { %571 = vsyncadd (%p822_p6), %s163_s10, 4294966272  ;;  %v595_v0 = vmov 0   ;;  %v260_v1 = vld [vmem:[%s812_s1 + $0x10] sm:$0xff]  ;;  %v258_v2 = vld [vmem:[%s812_s1] sm:$0xff]  ;;  %s440_s7 = sshll.u32 %s640_s16, 10  ;;  %s339_s17 = scalar_lea.sflag [#allocation4], %s716_s5 }
  0x36   : > { %493 = vset.pattern.permute.xlu1 %v595_v0  ;;  %492 = vset.pattern.permute.xlu0 %v595_v0  ;;  %v261_v3 = vld [vmem:[%s812_s1 + $0x18] sm:$0xff]  ;;  %v259_v4 = vld [vmem:[%s812_s1 + $0x8] sm:$0xff]  ;;  %v262_v6 = vld [vmem:[%s813_s2] sm:$0xff]  ;;  %s768_s16 = scalar_lea.hbm %s814_s3, %s440_s7  ;;  %p823_p12 = scmp.ne.s32.totalorder %s819_s24, 0 }
  0x37   : > { %286 = vperm.xlu1 %493, %v260_v1   ;;  %276 = vperm.xlu0 %492, %v258_v2   ;;  %v263_v5 = vld [vmem:[%s813_s2 + $0x8] sm:$0xff]  ;;  %v265_v7 = vld [vmem:[%s813_s2 + $0x18] sm:$0xff]  ;;  %v264_v8 = vld [vmem:[%s813_s2 + $0x10] sm:$0xff]  ;;  %s596_s23 = smov [#allocation5]  }
  0x38   : > { %v189_v9 = vld [vmem:[%s722_s11] sm:$0xff]  ;;  %v191_v10 = vld [vmem:[%s722_s11 + $0x10] sm:$0xff]  ;;  %v190_v11 = vld [vmem:[%s722_s11 + $0x8] sm:$0xff]  ;;  %s530_s20 = sshll.u32 %s596_s23, 4  ;;  %s531_s20 = int_to_ptr.vmem [resolvable:$false] %s530_s20 }
  0x39   : > { %v192_v12 = vld [vmem:[%s722_s11 + $0x18] sm:$0xff]  ;;  %v197_v13 = vadd.f32 %v191_v10, %v189_v9  ;;  %v193_v14 = vld [vmem:[%s722_s11 + $0x20] sm:$0xff]  ;;  %v194_v16 = vld [vmem:[%s722_s11 + $0x28] sm:$0xff]  ;;  %s532_s22 = scalar_lea.vmem %s531_s20, 2048 }
  0x3a   : > { %v206_v15 = vadd.f32 %v192_v12, %v190_v11  ;;  %v195_v18 = vld [vmem:[%s722_s11 + $0x30] sm:$0xff]  ;;  %v196_v20 = vld [vmem:[%s722_s11 + $0x38] sm:$0xff]  ;;  %s188_s11 = scalar_lea.vmem [#allocation5], %s432_s9 }
  0x3b   : > { %291 = vperm.xlu1 %493, %v261_v3   ;;  %281 = vperm.xlu0 %492, %v259_v4   ;;  %v198_v17 = vadd.f32 %v197_v13, %v193_v14  ;;  %s352_s6 = sshll.u32 %s188_s11, 4  ;;  %s763_s6 = int_to_ptr.vmem [resolvable:$true] %s352_s6 }
  0x3c   : > { %v207_v19 = vadd.f32 %v206_v15, %v194_v16  ;;  %s526_s19 = scalar_lea.vmem %s763_s6, 1024  ;;  %p533_p5 = scmp.lt.s32.totalorder %s763_s6, %s531_s20 }
  0x3d   : > { %v199_v21 = vadd.f32 %v198_v17, %v195_v18  ;;  %p527_p11 = scmp.ne.s32.totalorder %s763_s6, %s526_s19  ;;  %p534_p7 = scmp.lt.s32.totalorder %s532_s22, %s526_s19 }
  0x3e   : > { %v208_v22 = vadd.f32 %v207_v19, %v196_v20 }
  0x3f   : > { %309 = vperm.xlu1 %493, %v263_v5   ;;  %304 = vperm.xlu0 %492, %v262_v6   ;;  %v200_v23 = vrot.slane %v199_v21, 4  ;;  %p528_p13 = pnand %p527_p11, %p823_p12  ;;  %p535_p8 = por %p534_p7, %p533_p5 }
  0x40   : > { %v209_v24 = vrot.slane %v208_v22, 4 }
  0x41   : > { %v201_v25 = vadd.f32 %v200_v23, %v199_v21  ;;  %p529_p4 = pneg %p528_p13 }
  0x42   : > { %v210_v26 = vadd.f32 %v209_v24, %v208_v22 }
  0x43   : > { %319 = vperm.xlu1 %493, %v265_v7   ;;  %314 = vperm.xlu0 %492, %v264_v8   ;;  %v202_v27 = vrot.slane %v201_v25, 2  ;;  %p536_p10 = pnand %p535_p8, %p529_p4 }
  0x44   : > { %v211_v28 = vrot.slane %v210_v26, 2 }
  0x45   : > { %v203_v29 = vadd.f32 %v202_v27, %v201_v25 }
  0x46   : > { %v212_v30 = vadd.f32 %v211_v28, %v210_v26 }
  0x47   : > { %v204_v31 = vrot.slane %v203_v29, 1 }
  0x48   : > { %v213_v32 = vrot.slane %v212_v30, 1 }
  0x49   : > { %v205_v33 = vadd.f32 %v204_v31, %v203_v29 }
  0x4a   : > { %v214_v34 = vadd.f32 %v213_v32, %v212_v30 }
  0x4b   : > { %v216_v35 = vmul.f32 0.03125, %v205_v33 }
  0x4c   : > { %v217_v36 = vmul.f32 0.03125, %v214_v34 }
  0x4d   : > { %v218_v37 = vsub.f32 %v189_v9, %v216_v35  ;;  %v220_v38 = vsub.f32 %v191_v10, %v216_v35  ;;  %v222_v41 = vsub.f32 %v193_v14, %v216_v35  ;;  %v224_v47 = vsub.f32 %v195_v18, %v216_v35 }
  0x4e   : > { %v219_v39 = vsub.f32 %v190_v11, %v217_v36  ;;  %v221_v40 = vsub.f32 %v192_v12, %v217_v36  ;;  %v223_v44 = vsub.f32 %v194_v16, %v217_v36  ;;  %v225_v50 = vsub.f32 %v196_v20, %v217_v36 }
  0x4f   : > { %v226_v42 = vmul.f32 %v218_v37, %v218_v37  ;;  %v228_v43 = vmul.f32 %v220_v38, %v220_v38  ;;  %v230_v48 = vmul.f32 %v222_v41, %v222_v41  ;;  %v232_v53 = vmul.f32 %v224_v47, %v224_v47 }
  0x50   : > { %v227_v45 = vmul.f32 %v219_v39, %v219_v39  ;;  %v229_v46 = vmul.f32 %v221_v40, %v221_v40  ;;  %v231_v51 = vmul.f32 %v223_v44, %v223_v44  ;;  %v233_v55 = vmul.f32 %v225_v50, %v225_v50 }
  0x51   : > { %v234_v49 = vadd.f32 %v228_v43, %v226_v42 }
  0x52   : > { %v243_v52 = vadd.f32 %v229_v46, %v227_v45 }
  0x53   : > { %v235_v54 = vadd.f32 %v234_v49, %v230_v48 }
  0x54   : > { %v244_v56 = vadd.f32 %v243_v52, %v231_v51 }
  0x55   : > { %v236_v57 = vadd.f32 %v235_v54, %v232_v53 }
  0x56   : > { %v245_v58 = vadd.f32 %v244_v56, %v233_v55 }
  0x57   : > { %v237_v59 = vrot.slane %v236_v57, 4 }
  0x58   : > { %v246_v60 = vrot.slane %v245_v58, 4 }
  0x59   : > { %v238_v61 = vadd.f32 %v237_v59, %v236_v57 }
  0x5a   : > { %v247_v62 = vadd.f32 %v246_v60, %v245_v58 }
  0x5b   : > { %v239_v63 = vrot.slane %v238_v61, 2 }
  0x5c   : > { %v248_v0 = vrot.slane %v247_v62, 2 }
  0x5d   : > { %v240_v1 = vadd.f32 %v239_v63, %v238_v61 }
  0x5e   : > { %v249_v2 = vadd.f32 %v248_v0, %v247_v62 }
  0x5f   : > { %v241_v3 = vrot.slane %v240_v1, 1 }
  0x60   : > { %v250_v4 = vrot.slane %v249_v2, 1 }
  0x61   : > { %v242_v5 = vadd.f32 %v241_v3, %v240_v1 }
  0x62   : > { %v251_v6 = vadd.f32 %v250_v4, %v249_v2 }
  0x63   : > { %v252_v7 = vmul.f32 0.03125, %v242_v5 }
  0x64   : > { %v253_v8 = vmul.f32 0.03125, %v251_v6 }
  0x65   : > { %v254_v9 = vadd.f32 1e-06, %v252_v7 }
  0x66   : > { %v255_v10 = vadd.f32 1e-06, %v253_v8 }
  0x67   : > { %494 = vrsqrt.f32 %v254_v9 }
  0x68   : > { %496 = vrsqrt.f32 %v255_v10 }
  0x74   : > { %v495_v11 = vpop.eup %494 }
  0x75   : > { %v497_v12 = vpop.eup %496  ;;  %v266_v15 = vmul.f32 %v495_v11, %v218_v37  ;;  %v268_v17 = vmul.f32 %v495_v11, %v220_v38  ;;  %v270_v21 = vmul.f32 %v495_v11, %v222_v41  ;;  %v272_v23 = vmul.f32 %v495_v11, %v224_v47 }
  0x76   : > { %v267_v16 = vmul.f32 %v497_v12, %v219_v39  ;;  %v269_v18 = vmul.f32 %v497_v12, %v221_v40  ;;  %v271_v22 = vmul.f32 %v497_v12, %v223_v44  ;;  %v273_v24 = vmul.f32 %v497_v12, %v225_v50 }
  0xb2   : > { %v287_v13 = vpop.permute.xlu1 %286  ;;  %v277_v14 = vpop.permute.xlu0 %276 }
  0xb3   : > { %v294_v25 = vmul.f32 %v277_v14, %v266_v15  ;;  %v295_v26 = vmul.f32 %v277_v14, %v267_v16  ;;  %v298_v35 = vmul.f32 %v287_v13, %v270_v21  ;;  %v299_v36 = vmul.f32 %v287_v13, %v271_v22 }
  0xb6   : > { %v292_v19 = vpop.permute.xlu1 %291  ;;  %v282_v20 = vpop.permute.xlu0 %281 }
  0xb7   : > { %v296_v27 = vmul.f32 %v282_v20, %v268_v17  ;;  %v297_v28 = vmul.f32 %v282_v20, %v269_v18  ;;  %v300_v37 = vmul.f32 %v292_v19, %v272_v23  ;;  %v301_v38 = vmul.f32 %v292_v19, %v273_v24 }
  0xba   : > { %v310_v29 = vpop.permute.xlu1 %309  ;;  %v305_v30 = vpop.permute.xlu0 %304 }
  0xbb   : > { %v324_v31 = vadd.f32 %v310_v29, %v296_v27  ;;  %v325_v32 = vadd.f32 %v310_v29, %v297_v28  ;;  %v322_v33 = vadd.f32 %v305_v30, %v294_v25  ;;  %v323_v34 = vadd.f32 %v305_v30, %v295_v26 }
  0xbd   : > { %332 = vst [vmem:[%s188_s11 + $0x10] sm:$0xff] %v324_v31  ;;  %333 = vst [vmem:[%s188_s11 + $0x18] sm:$0xff] %v325_v32 }
  0xbe   : > { %330 = vst [vmem:[%s188_s11] sm:$0xff] %v322_v33  ;;  %331 = vst [vmem:[%s188_s11 + $0x8] sm:$0xff] %v323_v34  ;;  %v320_v39 = vpop.permute.xlu1 %319  ;;  %v315_v40 = vpop.permute.xlu0 %314 }
  0xbf   : > { %v328_v41 = vadd.f32 %v320_v39, %v300_v37  ;;  %v329_v42 = vadd.f32 %v320_v39, %v301_v38  ;;  %v326_v43 = vadd.f32 %v315_v40, %v298_v35  ;;  %v327_v44 = vadd.f32 %v315_v40, %v299_v36 }
  0xc1   : > { %336 = vst [vmem:[%s188_s11 + $0x30] sm:$0xff] %v328_v41  ;;  %337 = vst [vmem:[%s188_s11 + $0x38] sm:$0xff] %v329_v42 }
  0xc2   : > { %334 = vst [vmem:[%s188_s11 + $0x20] sm:$0xff] %v326_v43  ;;  %335 = vst [vmem:[%s188_s11 + $0x28] sm:$0xff] %v327_v44 }
  0xc3   : > { %539 = shalt.err (!%p536_p10)
}
  0xc4   : > { %s540_s26 = scalar_lea.hbm %s768_s16, 1024  ;;  %s544_s29 = scalar_lea.hbm %s814_s3, 2048 }
  0xc5   : > { %p541_p0 = scmp.ne.s32.totalorder %s768_s16, %s540_s26  ;;  %p545_p1 = scmp.lt.s32.totalorder %s768_s16, %s814_s3 }
  0xc6   : > { %p546_p3 = scmp.lt.s32.totalorder %s544_s29, %s540_s26 }
  0xc7   : > { %p542_p2 = pnand %p541_p0, %p823_p12 }
  0xc8   : > { %p547_p6 = por %p546_p3, %p545_p1 }
  0xc9   : > { %p543_p9 = pneg %p542_p2 }
  0xcb   : > { %p548_p11 = pnand %p547_p6, %p543_p9 }
  0xcd   : > { %551 = shalt.err (!%p548_p11)
}
  0xce   : > { %s597_s4 = smov 256   ;;  %s598_s11 = smov 16  }
  0xcf   : > { %443 = dma.vmem_to_hbm [thread:$0]  (%p823_p12), %s763_s6, 1024, %s768_s16, %s339_s17, %s597_s4, %s597_s4, %s598_s11  }
  0xd0 PF: > { %s367_s7 = sand.u32 1, %s578_s12   ;;  %p824_p13 = scmp.ne.s32.totalorder %s820_s25, 0 }
  0xd1   : > { %p825_p4 = scmp.ge.s32.totalorder %s590_s15, 2  ;;  %s368_s9 = scalar_lea.sflag [#allocation4], %s367_s7 }
  0xd3   : > { %p450_p5 = pnand %p825_p4, %p824_p13 }
  0xd5   : > { %p451_p7 = pneg %p450_p5 }
  0xd7   : > { %573 = dma.done.wait (%p451_p7), %s368_s9, 1024  }
  0xd8   : > { %575 = vsyncadd (%p451_p7), %s368_s9, 4294966272  ;;  %p16_p8 = scmp.ge.s32.totalorder %s644_s18, 4   ;;  %s826_s12 = smov %s582_s13 }
  0xd9   : > { %s827_s13 = smov %s586_s14  ;;  %s828_s14 = smov %s656_s21 }
  0xda   : > { %s829_s15 = smov %s644_s18  ;;  %18 = sbr.rel (!%p16_p8) target bundleno = 5 (0x5), region = 77 }
  0xdf   :  { %373 = vsyncpa [#allocation3], 1 }
  0xe0   :  { %375 = vsyncpa [#allocation3 + $0x1], 1 }
  0xe1   :  { %376 = vsyncpa [#allocation4], 1 }
  0xe2   :  { %378 = vsyncpa [#allocation4 + $0x1], 1 }

</bundles_post_ra>
